<compile_context>
chip_gen: v5e
topology: v5e:2x2
jax: 0.10.0
libtpu: 0.0.40
codegen_flags: <defaults>
</compile_context>

<pallas_src>
import math

import jax
import jax.numpy as jnp
from jax.experimental import pallas as pl
from jax.experimental.pallas import tpu as pltpu

_SQRT_2PI = math.sqrt(2.0 * math.pi)
# Use the same matmul precision in the kernel and in the reference so the ill-conditioned
# pdf (sigma == mu can be ~0) sees identical mu on both paths, compiled or interpreted.
_MM_PRECISION = jax.lax.Precision.HIGHEST


def gauss_policy_kernel(s_ref, a_ref, w1_ref, b1_ref, w2_ref, b2_ref,
                        wmu_ref, bmu_ref, p_ref):
    # --- MLP hidden layer: Linear(S,H) -> ReLU ---
    x = jnp.dot(s_ref[...], w1_ref[...],
                preferred_element_type=jnp.float32, precision=_MM_PRECISION)
    x = jnp.maximum(x + b1_ref[...], 0.0)

    # --- MLP output layer: Linear(H,H), no nonlinearity ---
    x = jnp.dot(x, w2_ref[...],
                preferred_element_type=jnp.float32, precision=_MM_PRECISION) + b2_ref[...]

    # --- mu head; sigma aliases mu (faithful to the PyTorch module) ---
    mu = jnp.dot(x, wmu_ref[...],
                 preferred_element_type=jnp.float32, precision=_MM_PRECISION) + bmu_ref[...]
    sigma = mu

    # --- Normal pdf of a under N(mu, sigma), exact f32 math (no approx reciprocal) ---
    diff = a_ref[...] - mu
    p_ref[...] = jnp.exp(-(diff * diff) / (2.0 * sigma * sigma)) / (sigma * _SQRT_2PI)


def _round_up(x, m):
    return ((x + m - 1) // m) * m


def gauss_policy_forward(s, a, params, *, tb_max=1024):
    """Fused forward pass. s: [B, S], a: [B, A] -> p: [B, A] (Gaussian pdf)."""
    w1, b1, w2, b2, wmu, bmu = params
    B, S = s.shape
    H = w1.shape[1]
    A = wmu.shape[1]

    # Batch tiling: near-equal tiles (rows a multiple of 8) to keep batch padding small,
    # and >=2 tiles when B allows so the "parallel" axis can use both v7x TensorCores.
    n_tiles = max(-(-B // tb_max), 2 if B >= 16 else 1)
    tb = _round_up(-(-B // n_tiles), 8)
    grid_n = -(-B // tb)
    b_pad = grid_n * tb

    # Only the batch axis is ever padded (by < tb rows); feature axes stay at true width.
    s_p = s if b_pad == B else jnp.zeros((b_pad, S), s.dtype).at[:B].set(s)
    a_p = a if b_pad == B else jnp.zeros((b_pad, A), a.dtype).at[:B].set(a)

    flops = 2 * b_pad * (S * H + H * H + H * A) + 8 * b_pad * A
    bytes_accessed = 4 * (b_pad * (S + 2 * A)
                          + S * H + H + H * H + H + H * A + A)

    p_pad = pl.pallas_call(
        gauss_policy_kernel,
        out_shape=jax.ShapeDtypeStruct((b_pad, A), jnp.float32),
        grid=(grid_n,),
        in_specs=[
            pl.BlockSpec((tb, S), lambda i: (i, 0)),   # s   (streamed over batch)
            pl.BlockSpec((tb, A), lambda i: (i, 0)),   # a   (streamed over batch)
            pl.BlockSpec((S, H), lambda i: (0, 0)),    # w1  (VMEM resident)
            pl.BlockSpec((1, H), lambda i: (0, 0)),    # b1
            pl.BlockSpec((H, H), lambda i: (0, 0)),    # w2
            pl.BlockSpec((1, H), lambda i: (0, 0)),    # b2
            pl.BlockSpec((H, A), lambda i: (0, 0)),    # wmu
            pl.BlockSpec((1, A), lambda i: (0, 0)),    # bmu
        ],
        out_specs=pl.BlockSpec((tb, A), lambda i: (i, 0)),
        compiler_params=pltpu.CompilerParams(
            dimension_semantics=("parallel",)),
        cost_estimate=pl.CostEstimate(
            flops=flops,
            transcendentals=b_pad * A,
            bytes_accessed=bytes_accessed),
    )(s_p, a_p, w1, b1, w2, b2, wmu, bmu)

    return p_pad if b_pad == B else p_pad[:B]


def init_params(key, state_dim, hidden_dim, action_dim):
    """Deterministic PyTorch-Linear-style uniform init."""
    ks = jax.random.split(key, 6)

    def lin(kw, kb, fan_in, fan_out):
        bound = 1.0 / math.sqrt(fan_in)
        w = jax.random.uniform(kw, (fan_in, fan_out), jnp.float32, -bound, bound)
        b = jax.random.uniform(kb, (1, fan_out), jnp.float32, -bound, bound)
        return w, b

    w1, b1 = lin(ks[0], ks[1], state_dim, hidden_dim)
    w2, b2 = lin(ks[2], ks[3], hidden_dim, hidden_dim)
    wmu, bmu = lin(ks[4], ks[5], hidden_dim, action_dim)
    return (w1, b1, w2, b2, wmu, bmu)


if __name__ == "__main__":
    B, STATE_DIM, HIDDEN_DIM, ACTION_DIM = 8, 16, 20, 4

    key = jax.random.PRNGKey(0)
    k_s, k_a, k_p = jax.random.split(key, 3)
    s = jax.random.normal(k_s, (B, STATE_DIM), jnp.float32)
    a = jax.random.normal(k_a, (B, ACTION_DIM), jnp.float32)
    params = init_params(k_p, STATE_DIM, HIDDEN_DIM, ACTION_DIM)

    forward = jax.jit(gauss_policy_forward)   # single jit: no per-call host-side prep
    p = forward(s, a, params)
    jax.block_until_ready(p)

    # Pure-JAX reference (same matmul sequence and precision as the kernel).
    w1, b1, w2, b2, wmu, bmu = params
    x = jnp.maximum(
        jnp.dot(s, w1, preferred_element_type=jnp.float32, precision=_MM_PRECISION) + b1, 0.0)
    x = jnp.dot(x, w2, preferred_element_type=jnp.float32, precision=_MM_PRECISION) + b2
    mu = jnp.dot(x, wmu, preferred_element_type=jnp.float32, precision=_MM_PRECISION) + bmu
    sigma = mu
    ref = jnp.exp(-((a - mu) ** 2) / (2.0 * sigma * sigma)) / (sigma * _SQRT_2PI)

    assert jnp.allclose(p, ref, rtol=1e-2, atol=1e-5), "mismatch vs reference"
    print("KERNEL_OK")
</pallas_src>

<mosaic_0001>
module attributes {stable_mosaic.version = 11 : i64} {
  func.func @gauss_policy_kernel(%arg0: i32, %arg1: memref<8x16xf32, #tpu.memory_space<vmem>>, %arg2: memref<8x4xf32, #tpu.memory_space<vmem>>, %arg3: memref<16x20xf32, #tpu.memory_space<vmem>>, %arg4: memref<1x20xf32, #tpu.memory_space<vmem>>, %arg5: memref<20x20xf32, #tpu.memory_space<vmem>>, %arg6: memref<1x20xf32, #tpu.memory_space<vmem>>, %arg7: memref<20x4xf32, #tpu.memory_space<vmem>>, %arg8: memref<1x4xf32, #tpu.memory_space<vmem>>, %arg9: memref<8x4xf32, #tpu.memory_space<vmem>>) attributes {dimension_semantics = [#tpu.dimension_semantics<parallel>], iteration_bounds = array<i64: 1>, scalar_prefetch = 0 : i64, scratch_operands = 0 : i64, tpu.core_type = #tpu.core_type<tc>, window_params = [{transform_indices = @transform_0, window_bounds = array<i64: 8, 16>}, {transform_indices = @transform_1, window_bounds = array<i64: 8, 4>}, {pipeline_mode = #tpu.pipeline_mode<synchronous>, transform_indices = @transform_2, window_bounds = array<i64: 16, 20>}, {pipeline_mode = #tpu.pipeline_mode<synchronous>, transform_indices = @transform_3, window_bounds = array<i64: 1, 20>}, {pipeline_mode = #tpu.pipeline_mode<synchronous>, transform_indices = @transform_4, window_bounds = array<i64: 20, 20>}, {pipeline_mode = #tpu.pipeline_mode<synchronous>, transform_indices = @transform_5, window_bounds = array<i64: 1, 20>}, {pipeline_mode = #tpu.pipeline_mode<synchronous>, transform_indices = @transform_6, window_bounds = array<i64: 20, 4>}, {pipeline_mode = #tpu.pipeline_mode<synchronous>, transform_indices = @transform_7, window_bounds = array<i64: 1, 4>}, {transform_indices = @transform_8, window_bounds = array<i64: 8, 4>}]} {
    %c0 = arith.constant 0 : index
    %c0_0 = arith.constant 0 : index
    %0 = vector.load %arg1[%c0, %c0_0] : memref<8x16xf32, #tpu.memory_space<vmem>>, vector<8x16xf32>
    %c0_1 = arith.constant 0 : index
    %c0_2 = arith.constant 0 : index
    %1 = vector.load %arg3[%c0_1, %c0_2] : memref<16x20xf32, #tpu.memory_space<vmem>>, vector<16x20xf32>
    %cst = arith.constant dense<0.000000e+00> : vector<8x20xf32>
    %2 = tpu.matmul %0, %1, %cst {dimension_numbers = #tpu.dot_dimension_numbers<[1], [0], [0], [1], [0, 0, 1, 1], [], []>, precision = #tpu.contract_precision<fp32>} : vector<8x16xf32>, vector<16x20xf32>, vector<8x20xf32> -> vector<8x20xf32>
    %c0_3 = arith.constant 0 : index
    %c0_4 = arith.constant 0 : index
    %3 = vector.load %arg4[%c0_3, %c0_4] : memref<1x20xf32, #tpu.memory_space<vmem>>, vector<1x20xf32>
    %4 = vector.broadcast %3 : vector<1x20xf32> to vector<8x20xf32>
    %5 = arith.addf %2, %4 : vector<8x20xf32>
    %cst_5 = arith.constant 0.000000e+00 : f32
    %6 = vector.broadcast %cst_5 : f32 to vector<8x20xf32>
    %7 = arith.maximumf %5, %6 : vector<8x20xf32>
    %c0_6 = arith.constant 0 : index
    %c0_7 = arith.constant 0 : index
    %8 = vector.load %arg5[%c0_6, %c0_7] : memref<20x20xf32, #tpu.memory_space<vmem>>, vector<20x20xf32>
    %cst_8 = arith.constant dense<0.000000e+00> : vector<8x20xf32>
    %9 = tpu.matmul %7, %8, %cst_8 {dimension_numbers = #tpu.dot_dimension_numbers<[1], [0], [0], [1], [0, 0, 1, 1], [], []>, precision = #tpu.contract_precision<fp32>} : vector<8x20xf32>, vector<20x20xf32>, vector<8x20xf32> -> vector<8x20xf32>
    %c0_9 = arith.constant 0 : index
    %c0_10 = arith.constant 0 : index
    %10 = vector.load %arg6[%c0_9, %c0_10] : memref<1x20xf32, #tpu.memory_space<vmem>>, vector<1x20xf32>
    %11 = vector.broadcast %10 : vector<1x20xf32> to vector<8x20xf32>
    %12 = arith.addf %9, %11 : vector<8x20xf32>
    %c0_11 = arith.constant 0 : index
    %c0_12 = arith.constant 0 : index
    %13 = vector.load %arg7[%c0_11, %c0_12] : memref<20x4xf32, #tpu.memory_space<vmem>>, vector<20x4xf32>
    %cst_13 = arith.constant dense<0.000000e+00> : vector<8x4xf32>
    %14 = tpu.matmul %12, %13, %cst_13 {dimension_numbers = #tpu.dot_dimension_numbers<[1], [0], [0], [1], [0, 0, 1, 1], [], []>, precision = #tpu.contract_precision<fp32>} : vector<8x20xf32>, vector<20x4xf32>, vector<8x4xf32> -> vector<8x4xf32>
    %c0_14 = arith.constant 0 : index
    %c0_15 = arith.constant 0 : index
    %15 = vector.load %arg8[%c0_14, %c0_15] : memref<1x4xf32, #tpu.memory_space<vmem>>, vector<1x4xf32>
    %16 = vector.broadcast %15 : vector<1x4xf32> to vector<8x4xf32>
    %17 = arith.addf %14, %16 : vector<8x4xf32>
    %c0_16 = arith.constant 0 : index
    %c0_17 = arith.constant 0 : index
    %18 = vector.load %arg2[%c0_16, %c0_17] : memref<8x4xf32, #tpu.memory_space<vmem>>, vector<8x4xf32>
    %19 = arith.subf %18, %17 : vector<8x4xf32>
    %20 = arith.mulf %19, %19 : vector<8x4xf32>
    %cst_18 = arith.constant 0.000000e+00 : f32
    %21 = vector.broadcast %cst_18 : f32 to vector<8x4xf32>
    %22 = arith.subf %21, %20 : vector<8x4xf32>
    %cst_19 = arith.constant 2.000000e+00 : f32
    %23 = vector.broadcast %cst_19 : f32 to vector<8x4xf32>
    %24 = arith.mulf %23, %17 : vector<8x4xf32>
    %25 = arith.mulf %24, %17 : vector<8x4xf32>
    %26 = arith.divf %22, %25 : vector<8x4xf32>
    %27 = math.exp %26 : vector<8x4xf32>
    %cst_20 = arith.constant 2.50662827 : f32
    %28 = vector.broadcast %cst_20 : f32 to vector<8x4xf32>
    %29 = arith.mulf %17, %28 : vector<8x4xf32>
    %30 = arith.divf %27, %29 : vector<8x4xf32>
    %c0_21 = arith.constant 0 : index
    %c0_22 = arith.constant 0 : index
    %31 = vector.load %arg9[%c0_21, %c0_22] : memref<8x4xf32, #tpu.memory_space<vmem>>, vector<8x4xf32>
    tpu.vector_store %arg9[%c0_21, %c0_22], %30 {strides = array<i32>} : memref<8x4xf32, #tpu.memory_space<vmem>>, vector<8x4xf32>,
    return
  }
  func.func @transform_0(%arg0: i32) -> (i32, i32) {
    %c0_i32 = arith.constant 0 : i32
    %c0_i32_0 = arith.constant 0 : i32
    return %arg0, %c0_i32 : i32, i32
  }
  func.func @transform_1(%arg0: i32) -> (i32, i32) {
    %c0_i32 = arith.constant 0 : i32
    %c0_i32_0 = arith.constant 0 : i32
    return %arg0, %c0_i32 : i32, i32
  }
  func.func @transform_2(%arg0: i32) -> (i32, i32) {
    %c0_i32 = arith.constant 0 : i32
    %c0_i32_0 = arith.constant 0 : i32
    %c0_i32_1 = arith.constant 0 : i32
    return %c0_i32, %c0_i32_0 : i32, i32
  }
  func.func @transform_3(%arg0: i32) -> (i32, i32) {
    %c0_i32 = arith.constant 0 : i32
    %c0_i32_0 = arith.constant 0 : i32
    %c0_i32_1 = arith.constant 0 : i32
    return %c0_i32, %c0_i32_0 : i32, i32
  }
  func.func @transform_4(%arg0: i32) -> (i32, i32) {
    %c0_i32 = arith.constant 0 : i32
    %c0_i32_0 = arith.constant 0 : i32
    %c0_i32_1 = arith.constant 0 : i32
    return %c0_i32, %c0_i32_0 : i32, i32
  }
  func.func @transform_5(%arg0: i32) -> (i32, i32) {
    %c0_i32 = arith.constant 0 : i32
    %c0_i32_0 = arith.constant 0 : i32
    %c0_i32_1 = arith.constant 0 : i32
    return %c0_i32, %c0_i32_0 : i32, i32
  }
  func.func @transform_6(%arg0: i32) -> (i32, i32) {
    %c0_i32 = arith.constant 0 : i32
    %c0_i32_0 = arith.constant 0 : i32
    %c0_i32_1 = arith.constant 0 : i32
    return %c0_i32, %c0_i32_0 : i32, i32
  }
  func.func @transform_7(%arg0: i32) -> (i32, i32) {
    %c0_i32 = arith.constant 0 : i32
    %c0_i32_0 = arith.constant 0 : i32
    %c0_i32_1 = arith.constant 0 : i32
    return %c0_i32, %c0_i32_0 : i32, i32
  }
  func.func @transform_8(%arg0: i32) -> (i32, i32) {
    %c0_i32 = arith.constant 0 : i32
    %c0_i32_0 = arith.constant 0 : i32
    return %arg0, %c0_i32 : i32, i32
  }
}

</mosaic_0001>

<bundles_post_ra>
// kernel: gauss_policy_forward.1
= control target key start
LH: loop header
LB: loop body
LE: loop exit
PB: predicated region body
PF: predicated region fallthrough
CT: control target
= control target key end

     0   :  { %13 = vsyncpa [#allocation3], 0  ;;  %s842_s0 = inlined_call_operand.hbm [shape: f32[8,16], index: 0, kind: input, shape index: {}]   ;;  %s843_s1 = inlined_call_operand.vmem [shape: f32[8,4], index: 1, kind: input, shape index: {}]   ;;  %s844_s2 = inlined_call_operand.vmem [shape: f32[16,20], index: 2, kind: input, shape index: {}]   ;;  %s845_s3 = inlined_call_operand.hbm [shape: f32[1,20], index: 3, kind: input, shape index: {}]   ;;  %s846_s4 = inlined_call_operand.vmem [shape: f32[20,20], index: 4, kind: input, shape index: {}]   ;;  %s847_s5 = inlined_call_operand.hbm [shape: f32[1,20], index: 5, kind: input, shape index: {}]   ;;  %s848_s6 = inlined_call_operand.vmem [shape: f32[20,4], index: 6, kind: input, shape index: {}]   ;;  %s849_s7 = inlined_call_operand.vmem [shape: f32[1,4], index: 7, kind: input, shape index: {}]   ;;  %s850_s8 = inlined_call_operand.vmem [shape: f32[8,4], index: 8, kind: output, shape index: {}]  }
   0x1   :  { %14 = vsyncpa [#allocation5], 0  ;;  %s35_s29 = sshll.u32 %s845_s3, 4  ;;  %s748_s30 = smov [#allocation4]   ;;  %s36_s29 = int_to_ptr.hbm [resolvable:$true] %s35_s29 }
   0x2   :  { %s37_s9 = sshll.u32 %s748_s30, 4  ;;  %s20_s12 = sshll.u32 %s842_s0, 4  ;;  %s38_s9 = int_to_ptr.vmem [resolvable:$true] %s37_s9  ;;  %s21_s12 = int_to_ptr.hbm [resolvable:$true] %s20_s12 }
   0x3   :  { %40 = dma.hbm_to_vmem [thread:$0]  %s36_s29, 16, %s38_s9, [#allocation5]  }
   0x4   :  { %s749_s13 = smov [#allocation2]   ;;  %s48_s17 = sshll.u32 %s847_s5, 4  ;;  %s49_s17 = int_to_ptr.hbm [resolvable:$true] %s48_s17 }
   0x5   :  { %s22_s14 = sshll.u32 %s749_s13, 4  ;;  %s750_s3 = smov [#allocation6]   ;;  %s23_s14 = int_to_ptr.vmem [resolvable:$true] %s22_s14 }
   0x6   :  { %25 = dma.hbm_to_vmem [thread:$0]  %s21_s12, 128, %s23_s14, [#allocation3]  }
   0x7   :  { %s50_s18 = sshll.u32 %s750_s3, 4  ;;  %s51_s18 = int_to_ptr.vmem [resolvable:$true] %s50_s18 }
   0x8   :  { %53 = dma.hbm_to_vmem [thread:$0]  %s49_s17, 16, %s51_s18, [#allocation5]  }
   0x9   :  { %744 = dma.done.wait [#allocation3], 128  }
   0xa   :  { %745 = vsyncadd [#allocation3], 4294967168 }
   0xb   :  { %746 = dma.done.wait [#allocation5], 32  }
   0xc   :  { %747 = vsyncadd [#allocation5], 4294967264  ;;  %vm77_vm0 = vcmask 130048   ;;  %v72_v0 = vld [vmem:[%s844_s2 + $0x8] sm:$0xff]  ;;  %v71_v1 = vld [vmem:[%s844_s2] sm:$0xff]  ;;  %vm252_vm1 = vcmask 1043456  }
   0xd   :  { %v70_v2 = vld [vmem:[#allocation2] sm:$0xff]  ;;  %v95_v3 = vand.u32 4294901760, %v72_v0  ;;  %v97_v4 = vand.u32 4294901760, %v71_v1  ;;  %v243_v19 = vld [vmem:[%s846_s4 + $0x10] sm:$0xf]  ;;  %v242_v22 = vld [vmem:[%s846_s4 + $0x8] sm:$0xff] }
   0xe   :  { %v79_v5 = vsel %vm77_vm0, %v70_v2, 0  ;;  %v254_v20 = vsel %vm252_vm1, %v243_v19, 0  ;;  %v271_v24 = vand.u32 4294901760, %v242_v22  ;;  %v241_v25 = vld [vmem:[%s846_s4] sm:$0xff]  ;;  %v430_v38 = vld [vmem:[%s848_s6 + $0x10] sm:$0xf] }
   0xf   :  { %v99_v6 = vand.u32 4294901760, %v79_v5  ;;  %v123_v7 = vsub.f32 %v72_v0, %v95_v3  ;;  %96 = vmatpush.msra.mxu0 %v95_v3  ;;  %v129_v8 = vsub.f32 %v71_v1, %v97_v4  ;;  %180 = vmatpush.msra.mxu3 %v95_v3  ;;  %v269_v21 = vand.u32 4294901760, %v254_v20  ;;  %v663_v41 = vld [vmem:[#allocation4] ss:$0 sm:$0xff]  ;;  %v428_v0 = vld [vmem:[%s848_s6] sm:$0xff] }
  0x10   :  { %v304_v27 = vsub.f32 %v242_v22, %v271_v24  ;;  %v273_v28 = vand.u32 4294901760, %v241_v25  ;;  %v439_v39 = vsel %vm252_vm1, %v430_v38, 0  ;;  %vm248_vm2 = vcmask 162816   ;;  %v429_v62 = vld [vmem:[%s848_s6 + $0x8] sm:$0xff] }
  0x11   :  { %v100_v9 = vsub.f32 %v79_v5, %v99_v6  ;;  %155 = vmatpush.msra.mxu2 %v123_v7  ;;  %98 = vmatpush.msra.mxu0 %v97_v4  ;;  %v124_v10 = vand.u32 4294901760, %v123_v7  ;;  %v130_v11 = vand.u32 4294901760, %v129_v8  ;;  %v298_v23 = vsub.f32 %v254_v20, %v269_v21 }
  0x12   :  { %182 = vmatpush.msra.mxu3 %v97_v4  ;;  %v305_v30 = vand.u32 4294901760, %v304_v27  ;;  %v310_v31 = vsub.f32 %v241_v25, %v273_v28  ;;  %v454_v40 = vand.u32 4294901760, %v439_v39  ;;  %v456_v63 = vand.u32 4294901760, %v429_v62 }
  0x13   :  { %v101_v12 = vand.u32 4294901760, %v100_v9  ;;  %158 = vmatpush.msra.mxu2 %v129_v8  ;;  %v125_v13 = vsub.f32 %v123_v7, %v124_v10  ;;  %207 = vmatpush.msrb.mxu0 %v124_v10  ;;  %v131_v14 = vsub.f32 %v129_v8, %v130_v11  ;;  %v299_v26 = vand.u32 4294901760, %v298_v23 }
  0x14   :  { %161 = vmatmul.f32.vlgmr.msra.gmra.mxu2 %v100_v9  ;;  %v306_v33 = vsub.f32 %v304_v27, %v305_v30  ;;  %v311_v34 = vand.u32 4294901760, %v310_v31  ;;  %v483_v61 = vsub.f32 %v439_v39, %v454_v40  ;;  %v489_v2 = vsub.f32 %v429_v62, %v456_v63 }
  0x15   :  { %v102_v15 = vsub.f32 %v100_v9, %v101_v12  ;;  %186 = vmatmul.f32.vlgmr.msra.gmra.mxu3 %v101_v12  ;;  %v126_v16 = vand.u32 4294901760, %v125_v13  ;;  %v132_v17 = vand.u32 4294901760, %v131_v14  ;;  %211 = vmatpush.msrb.mxu0 %v130_v11  ;;  %v300_v29 = vsub.f32 %v298_v23, %v299_v26  ;;  %v664_v13 = vld [vmem:[#allocation6] ss:$0 sm:$0xff] }
  0x16   :  { %270 = vmatpush.msrb.mxu2 %v269_v21  ;;  %v307_v35 = vand.u32 4294901760, %v306_v33  ;;  %v312_v36 = vsub.f32 %v310_v31, %v311_v34  ;;  %v484_v1 = vand.u32 4294901760, %v483_v61  ;;  %v490_v5 = vand.u32 4294901760, %v489_v2 }
  0x17   :  { %v103_v18 = vand.u32 4294901760, %v102_v15  ;;  %127 = vmatpush.msra.mxu1 %v126_v16  ;;  %v301_v32 = vand.u32 4294901760, %v300_v29  ;;  %vm652_vm11 = vcmask 31744  }
  0x18   :  { %272 = vmatpush.msrb.mxu2 %v271_v24  ;;  %v313_v37 = vand.u32 4294901760, %v312_v36  ;;  %v491_v8 = vsub.f32 %v489_v2, %v490_v5 }
  0x19   :  { %104 = vmatmul.f32.vlgmr.msra.gmra.mxu0 %v103_v18  ;;  %133 = vmatpush.msra.mxu1 %v132_v17 }
  0x1a   :  { %135 = vmatmul.f32.vlgmr.msra.gmra.mxu1 %v99_v6  ;;  %335 = vmatpush.msra.mxu0 %v298_v23  ;;  %v492_v10 = vand.u32 4294901760, %v491_v8 }
  0x1b   :  { %232 = vmatpush.msrb.mxu1 %v95_v3  ;;  %274 = vmatpush.msrb.mxu2 %v273_v28  ;;  %v458_v3 = vand.u32 4294901760, %v428_v0 }
  0x1c   :  { %338 = vmatpush.msra.mxu0 %v304_v27  ;;  %302 = vmatpush.msrb.mxu3 %v301_v32  ;;  %v665_v32 = vld [vmem:[%s849_s7] ss:$0 sm:$0xff] }
  0x1d   :  { %234 = vmatpush.msrb.mxu1 %v97_v4  ;;  %390 = vmatpush.msra.mxu2 %v299_v26  ;;  %v485_v4 = vsub.f32 %v483_v61, %v484_v1 }
  0x1e   :  { %341 = vmatpush.msra.mxu0 %v310_v31  ;;  %308 = vmatpush.msrb.mxu3 %v307_v35 }
  0x1f   :  { %362 = vmatpush.msra.mxu1 %v269_v21  ;;  %394 = vmatpush.msra.mxu2 %v305_v30  ;;  %v486_v7 = vand.u32 4294901760, %v485_v4 }
  0x20   :  { %314 = vmatpush.msrb.mxu3 %v313_v37 }
  0x21   :  { %213 = vmatmul.f32.vlgmr.msrb.gmra.mxu0 %v99_v6  ;;  %364 = vmatpush.msra.mxu1 %v271_v24 }
  0x22   :  { %236 = vmatmul.f32.vlgmr.msrb.gmra.mxu1 %v99_v6  ;;  %398 = vmatpush.msra.mxu2 %v311_v34  ;;  %v495_v6 = vsub.f32 %v428_v0, %v458_v3 }
  0x23   :  { %366 = vmatpush.msra.mxu1 %v273_v28  ;;  %418 = vmatpush.msra.mxu3 %v269_v21 }
  0x24   :  { %455 = vmatpush.msrb.mxu0 %v454_v40  ;;  %v496_v9 = vand.u32 4294901760, %v495_v6 }
  0x25   :  { %420 = vmatpush.msra.mxu3 %v271_v24  ;;  %487 = vmatpush.msrb.mxu1 %v486_v7 }
  0x26   :  { %457 = vmatpush.msrb.mxu0 %v456_v63  ;;  %v497_v11 = vsub.f32 %v495_v6, %v496_v9 }
  0x27   :  { %422 = vmatpush.msra.mxu3 %v273_v28  ;;  %493 = vmatpush.msrb.mxu1 %v492_v10 }
  0x28   :  { %459 = vmatpush.msrb.mxu0 %v458_v3  ;;  %v498_v12 = vand.u32 4294901760, %v497_v11 }
  0x2a   :  { %499 = vmatpush.msrb.mxu1 %v498_v12 }
  0x96   :  { %v105_v42 = vpop.f32.mrf.mxu0 }
  0x97   :  { %v106_v43 = vadd.f32 %v663_v41, %v105_v42  ;;  %v136_v44 = vpop.f32.mrf.mxu1  ;;  %v162_v45 = vpop.f32.mrf.mxu2 }
  0x98   :  { %v187_v47 = vpop.f32.mrf.mxu3 }
  0x99   :  { %v137_v46 = vadd.f32 %v136_v44, %v106_v43 }
  0x9b   :  { %v163_v48 = vadd.f32 %v162_v45, %v137_v46 }
  0x9d   :  { %v188_v49 = vadd.f32 %v187_v47, %v163_v48  ;;  %v613_v48 = vld [vmem:[%s843_s1] sm:$0xff] }
  0x9e   :  { %v214_v50 = vpop.f32.mrf.mxu0 }
  0x9f   :  { %v215_v51 = vadd.f32 %v214_v50, %v188_v49  ;;  %v237_v52 = vpop.f32.mrf.mxu1 }
  0xa1   :  { %v238_v53 = vadd.f32 %v237_v52, %v215_v51 }
  0xa3   :  { %v240_v54 = vmax.f32 %v238_v53, 0.0 }
  0xa5   :  { %v250_v55 = vsel %vm248_vm2, %v240_v54, 0 }
  0xa6   :  { %v275_v56 = vand.u32 4294901760, %v250_v55 }
  0xa8   :  { %v276_v57 = vsub.f32 %v250_v55, %v275_v56  ;;  %316 = vmatmul.f32.vlgmr.msrb.gmra.mxu3 %v275_v56 }
  0xa9   :  { %547 = vmatpush.msrb.mxu3 %v454_v40 }
  0xaa   :  { %344 = vmatmul.f32.vlgmr.msra.gmra.mxu0 %v276_v57  ;;  %v277_v58 = vand.u32 4294901760, %v276_v57 }
  0xab   :  { %549 = vmatpush.msrb.mxu3 %v456_v63  ;;  %575 = vmatpush.msra.mxu0 %v484_v1 }
  0xac   :  { %370 = vmatmul.f32.vlgmr.msra.gmra.mxu1 %v277_v58  ;;  %v278_v59 = vsub.f32 %v276_v57, %v277_v58 }
  0xad   :  { %551 = vmatpush.msrb.mxu3 %v458_v3  ;;  %579 = vmatpush.msra.mxu0 %v490_v5 }
  0xae   :  { %v279_v60 = vand.u32 4294901760, %v278_v59  ;;  %603 = vmatpush.msra.mxu1 %v454_v40 }
  0xaf   :  { %583 = vmatpush.msra.mxu0 %v496_v9 }
  0xb0   :  { %280 = vmatmul.f32.vlgmr.msrb.gmra.mxu2 %v279_v60  ;;  %424 = vmatmul.f32.vlgmr.msra.gmra.mxu3 %v275_v56 }
  0xb1   :  { %520 = vmatpush.msrb.mxu2 %v483_v61  ;;  %605 = vmatpush.msra.mxu1 %v456_v63 }
  0xb3   :  { %523 = vmatpush.msrb.mxu2 %v489_v2  ;;  %607 = vmatpush.msra.mxu1 %v458_v3 }
  0xb5   :  { %526 = vmatpush.msrb.mxu2 %v495_v6 }
  0xb8   :  { %400 = vmatmul.f32.vlgmr.msra.gmra.mxu2 %v275_v56 }
 0x127   :  { %v345_v18 = vpop.f32.mrf.mxu0 }
 0x129   :  { %v371_v20 = vpop.f32.mrf.mxu1 }
 0x12b   :  { %v317_v14 = vpop.f32.mrf.mxu3 }
 0x133   :  { %v281_v15 = vpop.f32.mrf.mxu2  ;;  %v425_v24 = vpop.f32.mrf.mxu3 }
 0x134   :  { %v282_v16 = vadd.f32 %v664_v13, %v281_v15 }
 0x136   :  { %v318_v17 = vadd.f32 %v317_v14, %v282_v16 }
 0x138   :  { %v346_v19 = vadd.f32 %v345_v18, %v318_v17 }
 0x13a   :  { %v372_v21 = vadd.f32 %v371_v20, %v346_v19 }
 0x13b   :  { %v401_v22 = vpop.f32.mrf.mxu2 }
 0x13c   :  { %v402_v23 = vadd.f32 %v401_v22, %v372_v21 }
 0x13e   :  { %v426_v25 = vadd.f32 %v425_v24, %v402_v23 }
 0x140   :  { %v436_v26 = vsel %vm248_vm2, %v426_v25, 0 }
 0x141   :  { %v460_v27 = vand.u32 4294901760, %v436_v26 }
 0x143   :  { %v461_v28 = vsub.f32 %v436_v26, %v460_v27  ;;  %501 = vmatmul.f32.vlgmr.msrb.gmra.mxu1 %v460_v27 }
 0x145   :  { %529 = vmatmul.f32.vlgmr.msrb.gmra.mxu2 %v461_v28  ;;  %v462_v29 = vand.u32 4294901760, %v461_v28 }
 0x147   :  { %555 = vmatmul.f32.vlgmr.msrb.gmra.mxu3 %v462_v29  ;;  %v463_v30 = vsub.f32 %v461_v28, %v462_v29 }
 0x149   :  { %v464_v31 = vand.u32 4294901760, %v463_v30 }
 0x14b   :  { %465 = vmatmul.f32.vlgmr.msrb.gmra.mxu0 %v464_v31  ;;  %609 = vmatmul.f32.vlgmr.msra.gmra.mxu1 %v460_v27 }
 0x153   :  { %585 = vmatmul.f32.vlgmr.msra.gmra.mxu0 %v460_v27 }
 0x1c0   :  { %v502_v33 = vpop.f32.mrf.mxu1 }
 0x1c8   :  { %v466_v34 = vpop.f32.mrf.mxu0  ;;  %v530_v37 = vpop.f32.mrf.mxu2 }
 0x1c9   :  { %v467_v35 = vadd.f32 %v665_v32, %v466_v34  ;;  %v610_v43 = vpop.f32.mrf.mxu1 }
 0x1ca   :  { %v556_v39 = vpop.f32.mrf.mxu3 }
 0x1cb   :  { %v503_v36 = vadd.f32 %v502_v33, %v467_v35 }
 0x1cd   :  { %v531_v38 = vadd.f32 %v530_v37, %v503_v36 }
 0x1cf   :  { %v557_v40 = vadd.f32 %v556_v39, %v531_v38 }
 0x1d0   :  { %v586_v41 = vpop.f32.mrf.mxu0 }
 0x1d1   :  { %v587_v42 = vadd.f32 %v586_v41, %v557_v40 }
 0x1d3   :  { %v611_v44 = vadd.f32 %v610_v43, %v587_v42 }
 0x1d5   :  { %v617_v45 = vmul.f32 2.0, %v611_v44  ;;  %v636_v46 = vmul.f32 2.5066283, %v611_v44  ;;  %v614_v51 = vsub.f32 %v613_v48, %v611_v44 }
 0x1d7   :  { %v618_v47 = vmul.f32 %v617_v45, %v611_v44  ;;  %666 = vrcp.f32 %v636_v46  ;;  %v615_v56 = vmul.f32 %v614_v51, %v614_v51  ;;  %v648_v5 = vand.u32 2147483648, %v636_v46 }
 0x1d8   :  { %vm642_vm8 = vweird.f32 %v636_v46  ;;  %v646_v6 = vand.u32 2147483647, %v636_v46 }
 0x1d9   :  { %668 = vrcp.f32 %v618_v47  ;;  %v630_v55 = vand.u32 2147483648, %v618_v47  ;;  %v628_v58 = vand.u32 2147483647, %v618_v47  ;;  %vm624_vm4 = vweird.f32 %v618_v47 }
 0x1da   :  { %v616_v62 = vsub.f32 0.0, %v615_v56  ;;  %v649_v8 = vor.u32 1.1754944e-38, %v648_v5  ;;  %vm647_vm10 = vcmp.eq.f32.partialorder %v646_v6, 8.507059e+37 }
 0x1db   :  { %v631_v61 = vor.u32 1.1754944e-38, %v630_v55  ;;  %vm629_vm6 = vcmp.eq.f32.partialorder %v628_v58, 8.507059e+37 }
 0x1dd   :  { %v667_v49 = vpop.eup %666 }
 0x1de   :  { %v638_v53 = vmul.f32 %v667_v49, %v636_v46  ;;  %vm643_vm7 = vweird.f32 %v667_v49 }
 0x1df   :  { %v669_v50 = vpop.eup %668  ;;  %vm644_vm9 = vmor %vm642_vm8, %vm643_vm7 }
 0x1e0   :  { %v620_v52 = vmul.f32 %v669_v50, %v618_v47  ;;  %vm625_vm3 = vweird.f32 %v669_v50  ;;  %v639_v59 = vsub.f32 1.0, %v638_v53 }
 0x1e1   :  { %vm626_vm5 = vmor %vm624_vm4, %vm625_vm3 }
 0x1e2   :  { %v621_v54 = vsub.f32 1.0, %v620_v52  ;;  %v640_v1 = vmul.f32 %v667_v49, %v639_v59 }
 0x1e4   :  { %v622_v57 = vmul.f32 %v669_v50, %v621_v54  ;;  %v641_v4 = vadd.f32 %v667_v49, %v640_v1 }
 0x1e6   :  { %v623_v60 = vadd.f32 %v669_v50, %v622_v57  ;;  %v645_v7 = vsel %vm644_vm9, %v667_v49, %v641_v4 }
 0x1e7   :  { %v650_v10 = vsel %vm647_vm10, %v649_v8, %v645_v7 }
 0x1e8   :  { %v627_v63 = vsel %vm626_vm5, %v669_v50, %v623_v60 }
 0x1e9   :  { %v632_v0 = vsel %vm629_vm6, %v631_v61, %v627_v63 }
 0x1ea   :  { %v633_v2 = vmul.f32 %v632_v0, %v616_v62 }
 0x1ec   :  { %v634_v3 = vmul.f32 1.442695, %v633_v2 }
 0x1ee   :  { %670 = vpow2.f32 %v634_v3 }
 0x1f4   :  { %v671_v9 = vpop.eup %670 }
 0x1f5   :  { %v651_v11 = vmul.f32 %v671_v9, %v650_v10 }
 0x1f7   :  { %653 = vst.msk [vmem:[%s850_s8] sm:$0xff] %vm652_vm11, %v651_v11 }
 0x1f8   :  { %658 = vsyncpa [#allocation3], 1 }
 0x1f9   :  { %659 = vsyncpa [#allocation5], 1 }

</bundles_post_ra>
